<compile_context>
chip_gen: v7x
topology: tpu7x:2x2x1
jax: 0.10.0
libtpu: 0.0.40
codegen_flags: <defaults>
</compile_context>

<pallas_src>
import jax
import jax.numpy as jnp
from jax.experimental import pallas as pl
from jax.experimental.pallas import tpu as pltpu

_LANE = 128
# 8 MiB blocks -> 32 MiB pipelined (in+out double-buffered); fits v7x's 64 MiB
# VMEM with headroom and is already ~roofline on v5e/v6e.
_TARGET_BLOCK_BYTES = 8 << 20
_VMEM_LIMIT_BYTES = 40 << 20
# Above this size, never collapse to a single block: keep >=2 "parallel"
# blocks so both TensorCores are used on megacore (v7x) parts.
_MIN_SPLIT_BYTES = 2 << 20


def _affine_kernel(w_ref, b_ref, x_ref, o_ref):
    # w_ref / b_ref are scalar-prefetch SMEM refs of shape (1,).
    # One VPU FMA per vreg; the kernel is HBM-bandwidth bound, so all the
    # tuning lives in the wrapper's blocking, not here.
    o_ref[...] = (w_ref[0] * x_ref[...] + b_ref[0]).astype(o_ref.dtype)


def linear_regression_forward(x, weight, bias, *, block_bytes=None, donate_x=False):
    """y = weight * x + bias with scalar weight/bias broadcast over x (any shape)."""
    orig_shape = x.shape
    dtype = x.dtype
    total = x.size
    itemsize = jnp.dtype(dtype).itemsize
    # Sublane packing: 8 rows for f32, 16 for bf16, 32 for int8/fp8.
    pack = 8 * max(1, 4 // itemsize)

    flat = x.reshape(-1)  # free for contiguous arrays

    # ---- Lane-dense 2-D view ------------------------------------------------
    padded = False
    if total % _LANE == 0:
        # Zero-copy path: pick the widest lane width that divides the total.
        if total % 512 == 0:
            width = 512
        elif total % 256 == 0:
            width = 256
        else:
            width = 128
    else:
        # Rare non-lane-aligned total: a lane-dense reshape is impossible
        # without padding.  This costs one extra HBM pass (pad) plus one on
        # the way out (slice); acceptable because such shapes are small or
        # pathological.  All 128-aligned inputs take the zero-copy path above.
        width = 512
        padded_total = pl.cdiv(total, width) * width
        flat = jnp.pad(flat, (0, padded_total - total))
        padded = True

    rows = flat.size // width
    x2d = flat.reshape(rows, width)

    # ---- Block size -----------------------------------------------------------
    target = _TARGET_BLOCK_BYTES if block_bytes is None else block_bytes
    row_bytes = width * itemsize
    block_rows = max(pack, (target // row_bytes) // pack * pack)

    if rows <= block_rows:
        if rows * row_bytes <= _MIN_SPLIT_BYTES or rows < 2 * pack:
            # Tiny input: one block, one grid step, no pipeline overhead.
            block_rows = rows
        else:
            # Medium input that fits one block: split into 2 parallel blocks
            # so a second TensorCore (v7x megacore) isn't left idle.
            block_rows = pl.cdiv(pl.cdiv(rows, 2), pack) * pack
    n_blocks = pl.cdiv(rows, block_rows)
    # Boundary block (rows % block_rows != 0) is masked by Pallas; no wrapper pad.
    semantics = ("parallel",) if n_blocks > 1 else ("arbitrary",)

    extra_kwargs = {}
    if donate_x and not padded:
        # Alias x to the output (halves peak HBM footprint).  Only valid on the
        # zero-copy path and only when the caller truly donates x.
        extra_kwargs["input_output_aliases"] = {2: 0}

    out2d = pl.pallas_call(
        _affine_kernel,
        out_shape=jax.ShapeDtypeStruct((rows, width), dtype),
        grid_spec=pltpu.PrefetchScalarGridSpec(
            num_scalar_prefetch=2,  # weight, bias -> SMEM
            grid=(n_blocks,),
            in_specs=[pl.BlockSpec((block_rows, width), lambda i, w, b: (i, 0))],
            out_specs=pl.BlockSpec((block_rows, width), lambda i, w, b: (i, 0)),
        ),
        compiler_params=pltpu.CompilerParams(
            dimension_semantics=semantics,
            vmem_limit_bytes=_VMEM_LIMIT_BYTES,
        ),
        **extra_kwargs,
    )(weight, bias, x2d)

    out = out2d.reshape(-1)
    if padded:
        out = out[:total]
    return out.reshape(orig_shape)


if __name__ == "__main__":
    key = jax.random.PRNGKey(0)
    k_w, k_b, k1, k2, k3 = jax.random.split(key, 5)

    # Parameters mirror nn.Parameter(torch.randn(1)) — deterministic init here.
    weight = jax.random.normal(k_w, (1,), dtype=jnp.float32)
    bias = jax.random.normal(k_b, (1,), dtype=jnp.float32)

    # 1) Primary small lane-aligned input (zero-copy path, single block).
    x1 = jax.random.normal(k1, (16, 128), dtype=jnp.float32)
    y1 = jax.block_until_ready(linear_regression_forward(x1, weight, bias))
    assert jnp.allclose(y1, weight[0] * x1 + bias[0], atol=1e-6), "mismatch (16x128)"

    # 2) Odd (non-128-aligned) shape: exercises the rare pad fallback.
    x2 = jax.random.normal(k2, (3, 5, 33), dtype=jnp.float32)
    y2 = jax.block_until_ready(linear_regression_forward(x2, weight, bias))
    assert jnp.allclose(y2, weight[0] * x2 + bias[0], atol=1e-6), "mismatch (3x5x33)"

    # 3) Multi-block grid with a masked boundary block (force small blocks):
    #    43 rows of 512, 8-row blocks -> grid of 6, last block has 3 valid rows.
    x3 = jax.random.normal(k3, (43, 512), dtype=jnp.float32)
    y3 = jax.block_until_ready(
        linear_regression_forward(x3, weight, bias, block_bytes=8 * 512 * 4)
    )
    assert jnp.allclose(y3, weight[0] * x3 + bias[0], atol=1e-6), "mismatch (43x512)"

    print("KERNEL_OK")
</pallas_src>

<mosaic_0001>
module attributes {stable_mosaic.version = 11 : i64} {
  func.func @_affine_kernel(%arg0: i32, %arg1: memref<1xf32, #tpu.memory_space<smem>>, %arg2: memref<1xf32, #tpu.memory_space<smem>>, %arg3: memref<4x512xf32, #tpu.memory_space<vmem>>, %arg4: memref<4x512xf32, #tpu.memory_space<vmem>>) attributes {dimension_semantics = [#tpu.dimension_semantics<arbitrary>], iteration_bounds = array<i64: 1>, scalar_prefetch = 2 : i64, scratch_operands = 0 : i64, tpu.core_type = #tpu.core_type<tc>, window_params = [{transform_indices = @transform_0, window_bounds = array<i64: 4, 512>}, {transform_indices = @transform_1, window_bounds = array<i64: 4, 512>}]} {
    %c0 = arith.constant 0 : index
    %0 = memref.load %arg1[%c0] : memref<1xf32, #tpu.memory_space<smem>>
    %c0_0 = arith.constant 0 : index
    %c0_1 = arith.constant 0 : index
    %1 = vector.load %arg3[%c0_0, %c0_1] : memref<4x512xf32, #tpu.memory_space<vmem>>, vector<4x512xf32>
    %2 = vector.broadcast %0 : f32 to vector<4x512xf32>
    %3 = arith.mulf %2, %1 : vector<4x512xf32>
    %c0_2 = arith.constant 0 : index
    %4 = memref.load %arg2[%c0_2] : memref<1xf32, #tpu.memory_space<smem>>
    %5 = vector.broadcast %4 : f32 to vector<4x512xf32>
    %6 = arith.addf %3, %5 : vector<4x512xf32>
    %c0_3 = arith.constant 0 : index
    %c0_4 = arith.constant 0 : index
    %7 = vector.load %arg4[%c0_3, %c0_4] : memref<4x512xf32, #tpu.memory_space<vmem>>, vector<4x512xf32>
    tpu.vector_store %arg4[%c0_3, %c0_4], %6 {strides = array<i32>} : memref<4x512xf32, #tpu.memory_space<vmem>>, vector<4x512xf32>,
    return
  }
  func.func @transform_0(%arg0: i32, %arg1: memref<1xf32, #tpu.memory_space<smem>>, %arg2: memref<1xf32, #tpu.memory_space<smem>>) -> (i32, i32) {
    %c0_i32 = arith.constant 0 : i32
    %c0_i32_0 = arith.constant 0 : i32
    return %arg0, %c0_i32 : i32, i32
  }
  func.func @transform_1(%arg0: i32, %arg1: memref<1xf32, #tpu.memory_space<smem>>, %arg2: memref<1xf32, #tpu.memory_space<smem>>) -> (i32, i32) {
    %c0_i32 = arith.constant 0 : i32
    %c0_i32_0 = arith.constant 0 : i32
    return %arg0, %c0_i32 : i32, i32
  }
}

</mosaic_0001>

<bundles_post_ra>
// kernel: tpu_custom_call.1
= control target key start
LH: loop header
LB: loop body
LE: loop exit
PB: predicated region body
PF: predicated region fallthrough
CT: control target
= control target key end

     0   :  { %10 = vsyncpa [#allocation6], 0  ;;  %s154_s0 = inlined_call_operand.<no memory space> [shape: f32[1], index: 0, kind: input, shape index: {}]   ;;  %s155_s1 = inlined_call_operand.<no memory space> [shape: f32[1], index: 1, kind: input, shape index: {}]   ;;  %s156_s2 = inlined_call_operand.hbm [shape: f32[4,512], index: 2, kind: input, shape index: {}]   ;;  %s157_s3 = inlined_call_operand.hbm [shape: f32[4,512], index: 3, kind: output, shape index: {}]  }
   0x1   :  { %11 = vsyncpa [#allocation7], 0  ;;  %s102_s12 = smov [#allocation5]   ;;  %s54_s16 = scalar_lea.hbm %s156_s2, 256 }
   0x2   :  { %s18_s13 = sshll.u32 %s102_s12, 4  ;;  %p55_p0 = scmp.ne.s32.totalorder %s156_s2, %s54_s16  ;;  %s19_s13 = int_to_ptr.vmem [resolvable:$true] %s18_s13 }
   0x3   :  { %p58_p1 = scmp.lt.u32.totalorder %s54_s16, %s156_s2 }
   0x5   :  { %p60_p2 = pnand %p58_p1, %p55_p0 }
   0x7   :  { %63 = shalt.err (!%p60_p2)
}
   0x8   :  { %s64_s21 = scalar_lea.vmem %s19_s13, 256  ;;  %p69_p4 = scmp.lt.s32.totalorder %s19_s13, %s19_s13 }
   0x9   :  { %p65_p3 = scmp.ne.s32.totalorder %s19_s13, %s64_s21  ;;  %p70_p5 = scmp.lt.s32.totalorder %s64_s21, %s64_s21 }
   0xb   :  { %p71_p6 = por %p70_p5, %p69_p4 }
   0xd   :  { %p72_p7 = pnand %p71_p6, %p65_p3 }
   0xf   :  { %75 = shalt.err (!%p72_p7)
}
  0x10   :  { %21 = dma.hbm_to_vmem [thread:$0]  %s156_s2, 256, %s19_s13, [#allocation6]  }
  0x11   :  { %98 = dma.done.wait [#allocation6], 256  }
  0x12   :  { %99 = vsyncadd [#allocation6], 4294967040  ;;  %v28_v0 = vstv %s154_s0  ;;  %v26_v1 = vld [vmem:[#allocation5] sm:$0xff]  ;;  %v32_v2 = vstv %s155_s1  ;;  %v27_v3 = vld [vmem:[#allocation5 + $0x8] sm:$0xff]  ;;  %s103_s28 = smov [#allocation8]  }
  0x13   :  { %s43_s29 = sshll.u32 %s103_s28, 4  ;;  %v29_v4 = vmul.f32 %v28_v0, %v26_v1  ;;  %v30_v5 = vmul.f32 %v28_v0, %v27_v3  ;;  %s44_s29 = int_to_ptr.vmem [resolvable:$true] %s43_s29 }
  0x14   :  { %s76_s2 = scalar_lea.vmem %s44_s29, 256  ;;  %p81_p9 = scmp.lt.s32.totalorder %s44_s29, %s44_s29 }
  0x15   :  { %v33_v6 = vadd.f32 %v32_v2, %v29_v4  ;;  %v34_v7 = vadd.f32 %v32_v2, %v30_v5  ;;  %p77_p8 = scmp.ne.s32.totalorder %s44_s29, %s76_s2  ;;  %p82_p10 = scmp.lt.s32.totalorder %s76_s2, %s76_s2 }
  0x17   :  { %35 = vst [vmem:[#allocation8] sm:$0xff] %v33_v6  ;;  %36 = vst [vmem:[#allocation8 + $0x8] sm:$0xff] %v34_v7  ;;  %p83_p11 = por %p82_p10, %p81_p9 }
  0x19   :  { %p84_p12 = pnand %p83_p11, %p77_p8 }
  0x1b   :  { %87 = shalt.err (!%p84_p12)
}
  0x1c   :  { %s88_s1 = scalar_lea.hbm %s157_s3, 256 }
  0x1d   :  { %p89_p13 = scmp.ne.s32.totalorder %s157_s3, %s88_s1  ;;  %p92_p0 = scmp.lt.u32.totalorder %s88_s1, %s157_s3 }
  0x1f   :  { %p94_p1 = pnand %p92_p0, %p89_p13 }
  0x21   :  { %97 = shalt.err (!%p94_p1)
}
  0x22   :  { %46 = dma.vmem_to_hbm [thread:$0]  %s44_s29, 256, %s157_s3, [#allocation7]  }
  0x23   :  { %100 = dma.done.wait [#allocation7], 256  }
  0x24   :  { %101 = vsyncadd [#allocation7], 4294967040 }
  0x25   :  { %50 = vsyncpa [#allocation6], 1 }
  0x26   :  { %51 = vsyncpa [#allocation7], 1 }

</bundles_post_ra>
